<compile_context>
chip_gen: v6e
topology: v6e:2x2x1
jax: 0.10.0
libtpu: 0.0.40
codegen_flags: <defaults>
</compile_context>

<pallas_src>
import jax
import jax.numpy as jnp
from jax.experimental import pallas as pl
from jax.experimental.pallas import tpu as pltpu

IN_FEATURES = 512
LANE = 128


def _round_up(n, m):
    return ((n + m - 1) // m) * m


def mynet_kernel(x_ref, w_ref, b_ref, o_ref):
    # Linear: logits = x @ W_pad + b_pad   (W_pad is (D, C_pad), pre-transposed on host)
    # x/W are bf16, accumulation is f32 on the MXU, bias add in f32.
    logits = jnp.dot(x_ref[...], w_ref[...],
                     preferred_element_type=jnp.float32) + b_ref[...]
    # Numerically stable softmax over the class (lane) axis. Padded classes carry a
    # -1e30 bias (and zero weights), so their exp is exactly 0 and the denominator is
    # exact over the real classes.
    m = jnp.max(logits, axis=1, keepdims=True)
    e = jnp.exp(logits - m)
    denom = jnp.sum(e, axis=1, keepdims=True)
    o_ref[...] = (e * pl.reciprocal(denom, approx=False)).astype(o_ref.dtype)


def prepare_params(w, b, lane=LANE):
    """One-time conversion of PyTorch-layout params (call at parameter-load time).

    w: (C, D), b: (C,) ->
      w_t_pad: (D, C_pad) bfloat16, transposed, zero-padded columns
      b_pad:   (1, C_pad) float32, -1e30 in padded columns (exp -> exactly 0)
    """
    C, D = w.shape
    c_pad = _round_up(C, lane)
    w_t_pad = jnp.zeros((D, c_pad), jnp.bfloat16).at[:, :C].set(
        jnp.transpose(w).astype(jnp.bfloat16))
    b_pad = jnp.full((1, c_pad), -1e30, jnp.float32).at[0, :C].set(
        b.astype(jnp.float32))
    return w_t_pad, b_pad


def mynet_forward_padded(x, w_t_pad, b_pad, *, tm_max=1024, out_dtype=jnp.float32):
    """Hot path. x: (B, 512); params from prepare_params().

    Returns the lane-dense padded probabilities (B, C_pad); padded columns are exactly 0.
    Slice to num_classes at the consumer (or fold into downstream ops) to avoid an extra
    HBM round trip here.
    """
    B, D = x.shape
    c_pad = w_t_pad.shape[1]

    # Stream x in bf16 (halves dominant HBM traffic, native bf16 MXU path).
    if x.dtype != jnp.bfloat16:
        x = x.astype(jnp.bfloat16)

    # Row tile: multiple of 8 sublanes, capped at tm_max, and chosen so the batch splits
    # into >=2 balanced tiles whenever B > 8 (so both v7x TensorCores get work).
    tm = min(tm_max, _round_up(max(1, (B + 1) // 2), 8))
    grid = (pl.cdiv(B, tm),)

    cost = pl.CostEstimate(
        flops=2 * B * D * c_pad,
        transcendentals=B * c_pad,                         # exp per output element
        bytes_accessed=(x.size * 2                         # x stream (bf16)
                        + w_t_pad.size * 2                 # W (bf16, resident)
                        + b_pad.size * 4                   # b (f32)
                        + B * c_pad * jnp.dtype(out_dtype).itemsize),
    )

    out_pad = pl.pallas_call(
        mynet_kernel,
        out_shape=jax.ShapeDtypeStruct((B, c_pad), out_dtype),
        grid_spec=pltpu.PrefetchScalarGridSpec(
            num_scalar_prefetch=0,
            grid=grid,
            in_specs=[
                pl.BlockSpec((tm, D), lambda i: (i, 0)),      # x: streamed per tile
                pl.BlockSpec((D, c_pad), lambda i: (0, 0)),   # W: resident across grid
                pl.BlockSpec((1, c_pad), lambda i: (0, 0)),   # b: resident across grid
            ],
            out_specs=pl.BlockSpec((tm, c_pad), lambda i: (i, 0)),
        ),
        compiler_params=pltpu.CompilerParams(
            dimension_semantics=("parallel",),   # shard batch tiles across TCs (v7x)
            vmem_limit_bytes=32 * 1024 * 1024,   # headroom for larger tm_max choices
        ),
        cost_estimate=cost,
    )(x, w_t_pad, b_pad)
    return out_pad


def mynet_forward(x, w_t_pad, b_pad, num_classes, **kw):
    """Convenience wrapper matching MyNet.forward output shape (B, num_classes)."""
    return mynet_forward_padded(x, w_t_pad, b_pad, **kw)[:, :num_classes]


if __name__ == "__main__":
    num_classes = 65
    in_features = IN_FEATURES
    batch = 8

    key = jax.random.PRNGKey(0)
    kx, kw, kb = jax.random.split(key, 3)

    # Deterministic synthetic parameters (match nn.Linear default init range).
    bound = 1.0 / jnp.sqrt(jnp.float32(in_features))
    w = jax.random.uniform(kw, (num_classes, in_features), jnp.float32,
                           minval=-bound, maxval=bound)
    b = jax.random.uniform(kb, (num_classes,), jnp.float32,
                           minval=-bound, maxval=bound)
    x = jax.random.normal(kx, (batch, in_features), jnp.float32)

    # Hoisted out of the forward path: done once at "parameter load" time.
    w_t_pad, b_pad = prepare_params(w, b)

    # Hot path returns the padded lane-dense output; slice only at the consumer.
    out_pad = mynet_forward_padded(x, w_t_pad, b_pad)
    out_pad = jax.block_until_ready(out_pad)
    out = out_pad[:, :num_classes]

    assert out_pad.shape == (batch, 128)
    assert out.shape == (batch, num_classes)
    # Padded columns must be exactly zero.
    assert jnp.all(out_pad[:, num_classes:] == 0.0)

    # Tight check against a reference using the same bf16-quantized inputs.
    xq = x.astype(jnp.bfloat16).astype(jnp.float32)
    wq = w.astype(jnp.bfloat16).astype(jnp.float32)
    ref_q = jax.nn.softmax(xq @ wq.T + b, axis=1)
    assert jnp.allclose(out, ref_q, atol=1e-4, rtol=1e-4)

    # Loose check against the full-f32 PyTorch-equivalent reference (bf16 streaming).
    ref = jax.nn.softmax(x @ w.T + b, axis=1)
    assert jnp.allclose(out, ref, atol=5e-3, rtol=5e-3)

    # Exact reciprocal -> rows normalize to 1 up to f32 rounding.
    assert jnp.allclose(jnp.sum(out, axis=1), 1.0, atol=1e-4)

    print("KERNEL_OK")
</pallas_src>

<mosaic_0001>
module attributes {stable_mosaic.version = 11 : i64} {
  func.func @mynet_kernel(%arg0: i32, %arg1: memref<8x512xbf16, #tpu.memory_space<vmem>>, %arg2: memref<512x128xbf16, #tpu.memory_space<vmem>>, %arg3: memref<1x128xf32, #tpu.memory_space<vmem>>, %arg4: memref<8x128xf32, #tpu.memory_space<vmem>>) attributes {dimension_semantics = [#tpu.dimension_semantics<parallel>], iteration_bounds = array<i64: 1>, scalar_prefetch = 0 : i64, scratch_operands = 0 : i64, tpu.core_type = #tpu.core_type<tc>, window_params = [{transform_indices = @transform_0, window_bounds = array<i64: 8, 512>}, {pipeline_mode = #tpu.pipeline_mode<synchronous>, transform_indices = @transform_1, window_bounds = array<i64: 512, 128>}, {pipeline_mode = #tpu.pipeline_mode<synchronous>, transform_indices = @transform_2, window_bounds = array<i64: 1, 128>}, {transform_indices = @transform_3, window_bounds = array<i64: 8, 128>}]} {
    %c0 = arith.constant 0 : index
    %c0_0 = arith.constant 0 : index
    %0 = vector.load %arg1[%c0, %c0_0] : memref<8x512xbf16, #tpu.memory_space<vmem>>, vector<8x512xbf16>
    %c0_1 = arith.constant 0 : index
    %c0_2 = arith.constant 0 : index
    %1 = vector.load %arg2[%c0_1, %c0_2] : memref<512x128xbf16, #tpu.memory_space<vmem>>, vector<512x128xbf16>
    %cst = arith.constant dense<0.000000e+00> : vector<8x128xf32>
    %2 = tpu.matmul %0, %1, %cst {dimension_numbers = #tpu.dot_dimension_numbers<[1], [0], [0], [1], [0, 0, 1, 1], [], []>} : vector<8x512xbf16>, vector<512x128xbf16>, vector<8x128xf32> -> vector<8x128xf32>
    %c0_3 = arith.constant 0 : index
    %c0_4 = arith.constant 0 : index
    %3 = vector.load %arg3[%c0_3, %c0_4] : memref<1x128xf32, #tpu.memory_space<vmem>>, vector<1x128xf32>
    %4 = vector.broadcast %3 : vector<1x128xf32> to vector<8x128xf32>
    %5 = arith.addf %2, %4 : vector<8x128xf32>
    %cst_5 = arith.constant dense<0xFF800000> : vector<8xf32>
    %6 = vector.multi_reduction <maximumf>, %5, %cst_5 [1] : vector<8x128xf32> to vector<8xf32>
    %7 = vector.shape_cast %6 : vector<8xf32> to vector<8x1xf32>
    %8 = vector.broadcast %7 : vector<8x1xf32> to vector<8x128xf32>
    %9 = arith.subf %5, %8 : vector<8x128xf32>
    %10 = math.exp %9 : vector<8x128xf32>
    %cst_6 = arith.constant dense<0.000000e+00> : vector<8xf32>
    %11 = vector.multi_reduction <add>, %10, %cst_6 [1] : vector<8x128xf32> to vector<8xf32>
    %12 = vector.shape_cast %11 : vector<8xf32> to vector<8x1xf32>
    %13 = tpu.reciprocal %12 : vector<8x1xf32> -> vector<8x1xf32>
    %14 = vector.broadcast %13 : vector<8x1xf32> to vector<8x128xf32>
    %15 = arith.mulf %10, %14 : vector<8x128xf32>
    %c0_7 = arith.constant 0 : index
    %c0_8 = arith.constant 0 : index
    %16 = vector.load %arg4[%c0_7, %c0_8] : memref<8x128xf32, #tpu.memory_space<vmem>>, vector<8x128xf32>
    tpu.vector_store %arg4[%c0_7, %c0_8], %15 {strides = array<i32>} : memref<8x128xf32, #tpu.memory_space<vmem>>, vector<8x128xf32>,
    return
  }
  func.func @transform_0(%arg0: i32) -> (i32, i32) {
    %c0_i32 = arith.constant 0 : i32
    %c0_i32_0 = arith.constant 0 : i32
    return %arg0, %c0_i32 : i32, i32
  }
  func.func @transform_1(%arg0: i32) -> (i32, i32) {
    %c0_i32 = arith.constant 0 : i32
    %c0_i32_0 = arith.constant 0 : i32
    %c0_i32_1 = arith.constant 0 : i32
    return %c0_i32, %c0_i32_0 : i32, i32
  }
  func.func @transform_2(%arg0: i32) -> (i32, i32) {
    %c0_i32 = arith.constant 0 : i32
    %c0_i32_0 = arith.constant 0 : i32
    %c0_i32_1 = arith.constant 0 : i32
    return %c0_i32, %c0_i32_0 : i32, i32
  }
  func.func @transform_3(%arg0: i32) -> (i32, i32) {
    %c0_i32 = arith.constant 0 : i32
    %c0_i32_0 = arith.constant 0 : i32
    return %arg0, %c0_i32 : i32, i32
  }
}

</mosaic_0001>

<bundles_post_ra>
// kernel: tpu_custom_call.1
= control target key start
LH: loop header
LB: loop body
LE: loop exit
PB: predicated region body
PF: predicated region fallthrough
CT: control target
= control target key end

     0   :  { %8 = vsyncpa [#allocation3], 0  ;;  %s656_s0 = inlined_call_operand.hbm [shape: bf16[8,512], index: 0, kind: input, shape index: {}]   ;;  %s657_s1 = inlined_call_operand.hbm [shape: bf16[512,128], index: 1, kind: input, shape index: {}]   ;;  %s658_s2 = inlined_call_operand.vmem [shape: f32[1,128], index: 2, kind: input, shape index: {}]   ;;  %s659_s3 = inlined_call_operand.hbm [shape: f32[8,128], index: 3, kind: output, shape index: {}]  }
   0x1   :  { %9 = vsyncpa [#allocation6], 0 }
   0x2   :  { %10 = vsyncpa [#allocation4], 0  ;;  %s619_s12 = smov [#allocation2]   ;;  %s620_s14 = smov [#allocation5]  }
   0x3   :  { %s17_s13 = sshll.u32 %s619_s12, 4  ;;  %s26_s15 = sshll.u32 %s620_s14, 4  ;;  %s18_s13 = int_to_ptr.vmem [resolvable:$true] %s17_s13  ;;  %s27_s15 = int_to_ptr.vmem [resolvable:$true] %s26_s15 }
   0x4   :  { %s561_s16 = scalar_lea.vmem %s18_s13, 256  ;;  %p566_p1 = scmp.lt.s32.totalorder %s18_s13, %s18_s13 }
   0x5   :  { %p562_p0 = scmp.ne.s32.totalorder %s18_s13, %s561_s16  ;;  %p567_p2 = scmp.lt.s32.totalorder %s561_s16, %s561_s16 }
   0x7   :  { %p568_p3 = por %p567_p2, %p566_p1 }
   0x9   :  { %p569_p4 = pnand %p568_p3, %p562_p0 }
   0xb   :  { %572 = shalt.err (!%p569_p4)
}
   0xc   :  { %20 = dma.hbm_to_vmem [thread:$0]  %s656_s0, 256, %s18_s13, [#allocation3]  }
   0xd   :  { %s581_s19 = scalar_lea.vmem %s27_s15, 4096  ;;  %p586_p6 = scmp.lt.s32.totalorder %s27_s15, %s27_s15 }
   0xe   :  { %p582_p5 = scmp.ne.s32.totalorder %s27_s15, %s581_s19  ;;  %p587_p7 = scmp.lt.s32.totalorder %s581_s19, %s581_s19 }
  0x10   :  { %p588_p8 = por %p587_p7, %p586_p6 }
  0x12   :  { %p589_p9 = pnand %p588_p8, %p582_p5 }
  0x14   :  { %592 = shalt.err (!%p589_p9)
}
  0x15   :  { %s621_s20 = smov 64   ;;  %s622_s21 = smov 4  }
  0x16   :  { %32 = dma.hbm_to_vmem [thread:$0]  %s657_s1, 4096, %s27_s15, [#allocation6], %s621_s20, %s621_s20, %s622_s21  }
  0x17   :  { %613 = dma.done.wait [#allocation3], 256  }
  0x18   :  { %614 = vsyncadd [#allocation3], 4294967040 }
  0x19   :  { %615 = dma.done.wait [#allocation6], 4096  }
  0x1a   :  { %616 = vsyncadd [#allocation6], 4294963200  ;;  %v513_v0 = vld [vmem:[#allocation5 + $0x78] sm:$0xff]   ;;  %v517_v4 = vld [vmem:[#allocation5 + $0x70] sm:$0xff]  }
  0x1b   :  { %v514_v1 = vld [vmem:[#allocation5 + $0xf8] sm:$0xff]   ;;  %464 = vmatprep.subr.bf16.mxu0 %v513_v0  ;;  %v518_v5 = vld [vmem:[#allocation5 + $0xf0] sm:$0xff]   ;;  %v521_v8 = vld [vmem:[#allocation5 + $0x68] sm:$0xff]  }
  0x1c   :  { %v515_v2 = vld [vmem:[#allocation5 + $0x38] sm:$0xff]   ;;  %486 = vmatprep.subr.bf16.mxu1 %v514_v1  ;;  %v519_v6 = vld [vmem:[#allocation5 + $0x30] sm:$0xff]   ;;  %v522_v9 = vld [vmem:[#allocation5 + $0xe8] sm:$0xff]  }
  0x1d   :  { %v516_v3 = vld [vmem:[#allocation5 + $0xb8] sm:$0xff]   ;;  %465 = vmatpush3.bf16.msra.mxu0 %v515_v2  ;;  %v520_v7 = vld [vmem:[#allocation5 + $0xb0] sm:$0xff]   ;;  %v523_v10 = vld [vmem:[#allocation5 + $0x28] sm:$0xff]  }
  0x1e   :  { %487 = vmatpush3.bf16.msra.mxu1 %v516_v3  ;;  %466 = vmatprep.subr.bf16.mxu0 %v517_v4  ;;  %v524_v11 = vld [vmem:[#allocation5 + $0xa8] sm:$0xff]   ;;  %v525_v12 = vld [vmem:[#allocation5 + $0x60] sm:$0xff]   ;;  %v529_v16 = vld [vmem:[#allocation5 + $0x58] sm:$0xff]  }
  0x1f   :  { %488 = vmatprep.subr.bf16.mxu1 %v518_v5  ;;  %v526_v13 = vld [vmem:[#allocation5 + $0xe0] sm:$0xff]   ;;  %v530_v17 = vld [vmem:[#allocation5 + $0xd8] sm:$0xff]   ;;  %v533_v20 = vld [vmem:[#allocation5 + $0x50] sm:$0xff]  }
  0x20   :  { %v527_v14 = vld [vmem:[#allocation5 + $0x20] sm:$0xff]   ;;  %v531_v18 = vld [vmem:[#allocation5 + $0x18] sm:$0xff]   ;;  %v534_v21 = vld [vmem:[#allocation5 + $0xd0] sm:$0xff]  }
  0x21   :  { %467 = vmatpush3.bf16.msra.mxu0 %v519_v6  ;;  %v528_v15 = vld [vmem:[#allocation5 + $0xa0] sm:$0xff]   ;;  %v532_v19 = vld [vmem:[#allocation5 + $0x98] sm:$0xff]   ;;  %v535_v22 = vld [vmem:[#allocation5 + $0x10] sm:$0xff]  }
  0x22   :  { %489 = vmatpush3.bf16.msra.mxu1 %v520_v7  ;;  %468 = vmatprep.subr.bf16.mxu0 %v521_v8  ;;  %v536_v23 = vld [vmem:[#allocation5 + $0x90] sm:$0xff]   ;;  %v537_v24 = vld [vmem:[#allocation5 + $0x48] sm:$0xff]   ;;  %v541_v28 = vld [vmem:[#allocation5 + $0x40] sm:$0xff]  }
  0x23   :  { %490 = vmatprep.subr.bf16.mxu1 %v522_v9  ;;  %v538_v25 = vld [vmem:[#allocation5 + $0xc8] sm:$0xff]   ;;  %v542_v29 = vld [vmem:[#allocation5 + $0xc0] sm:$0xff]   ;;  %v42_v32 = vld [vmem:[#allocation2] sm:$0xff] }
  0x24   :  { %v539_v26 = vld [vmem:[#allocation5 + $0x8] sm:$0xff]   ;;  %v543_v30 = vld [vmem:[#allocation5] sm:$0xff]   ;;  %v43_v33 = vld [vmem:[#allocation2 + $0x8] sm:$0xff]  ;;  %v428_v34 = vcombine.low %v42_v32, %v42_v32  ;;  %v429_v35 = vcombine.high %v42_v32, %v42_v32 }
  0x25   :  { %469 = vmatpush3.bf16.msra.mxu0 %v523_v10  ;;  %v540_v27 = vld [vmem:[#allocation5 + $0x88] sm:$0xff]   ;;  %v544_v31 = vld [vmem:[#allocation5 + $0x80] sm:$0xff]   ;;  %v430_v36 = vcombine.low %v43_v33, %v43_v33  ;;  %v431_v37 = vcombine.high %v43_v33, %v43_v33  ;;  %v427_v40 = vld [vmem:[%s658_s2] ss:$0 sm:$0xff]  ;;  %s623_s2 = smov [#allocation7]  }
  0x26   :  { %491 = vmatpush3.bf16.msra.mxu1 %v524_v11  ;;  %470 = vmatprep.subr.bf16.mxu0 %v525_v12  ;;  %s417_s24 = sshll.u32 %s623_s2, 4  ;;  %s418_s24 = int_to_ptr.vmem [resolvable:$true] %s417_s24 }
  0x27   :  { %492 = vmatprep.subr.bf16.mxu1 %v526_v13  ;;  %353 = vmatprep.mubr.bf16.mxu0 %v429_v35  ;;  %s593_s25 = scalar_lea.vmem %s418_s24, 128  ;;  %p598_p11 = scmp.lt.s32.totalorder %s418_s24, %s418_s24 }
  0x28   :  { %393 = vmatprep.mubr.bf16.mxu1 %v431_v37  ;;  %p594_p10 = scmp.ne.s32.totalorder %s418_s24, %s593_s25  ;;  %p599_p12 = scmp.lt.s32.totalorder %s593_s25, %s593_s25 }
  0x29   :  { %471 = vmatpush3.bf16.msra.mxu0 %v527_v14 }
  0x2a   :  { %493 = vmatpush3.bf16.msra.mxu1 %v528_v15  ;;  %472 = vmatprep.subr.bf16.mxu0 %v529_v16  ;;  %p600_p13 = por %p599_p12, %p598_p11 }
  0x2b   :  { %494 = vmatprep.subr.bf16.mxu1 %v530_v17 }
  0x2c   :  { %p601_p0 = pnand %p600_p13, %p594_p10 }
  0x2d   :  { %473 = vmatpush3.bf16.msra.mxu0 %v531_v18 }
  0x2e   :  { %495 = vmatpush3.bf16.msra.mxu1 %v532_v19  ;;  %474 = vmatprep.subr.bf16.mxu0 %v533_v20 }
  0x2f   :  { %496 = vmatprep.subr.bf16.mxu1 %v534_v21 }
  0x31   :  { %475 = vmatpush3.bf16.msra.mxu0 %v535_v22 }
  0x32   :  { %497 = vmatpush3.bf16.msra.mxu1 %v536_v23  ;;  %476 = vmatprep.subr.bf16.mxu0 %v537_v24 }
  0x33   :  { %498 = vmatprep.subr.bf16.mxu1 %v538_v25 }
  0x35   :  { %477 = vmatpush3.bf16.msra.mxu0 %v539_v26 }
  0x36   :  { %499 = vmatpush3.bf16.msra.mxu1 %v540_v27  ;;  %478 = vmatprep.subr.bf16.mxu0 %v541_v28 }
  0x37   :  { %500 = vmatprep.subr.bf16.mxu1 %v542_v29 }
  0x39   :  { %479 = vmatpush3.bf16.msra.mxu0 %v543_v30 }
  0x3a   :  { %501 = vmatpush3.bf16.msra.mxu1 %v544_v31 }
  0x3c   :  { %354 = vmatmul.mubr.bf16.vlgmr.msra.gmra.mxu0 %v428_v34 }
  0x3d   :  { %394 = vmatmul.mubr.bf16.vlgmr.msra.gmra.mxu1 %v430_v36 }
  0xfc   :  { %v480_v38 = vpop.f32.mrf.mxu0 }
  0xfd   :  { %v502_v39 = vpop.f32.mrf.mxu1 }
  0xfe   :  { %v481_v41 = vpop.f32.mrf.mxu0 }
  0xff   :  { %v503_v42 = vpop.f32.mrf.mxu1  ;;  %v482_v43 = vadd.f32 %v481_v41, %v480_v38 }
 0x100   :  { %v483_v44 = vpop.f32.mrf.mxu0  ;;  %v504_v47 = vadd.f32 %v503_v42, %v502_v39 }
 0x101   :  { %v505_v45 = vpop.f32.mrf.mxu1  ;;  %v356_v46 = vadd.f32 %v482_v43, %v427_v40 }
 0x102   :  { %v484_v48 = vpop.f32.mrf.mxu0 }
 0x103   :  { %v506_v49 = vpop.f32.mrf.mxu1  ;;  %v396_v50 = vadd.f32 %v504_v47, %v356_v46 }
 0x105   :  { %401 = vmax.xlane.f32.xlu0 %v396_v50 }
 0x18e   :  { %v402_v51 = vpop.xlane.xlu0 %401 }
 0x18f   :  { %v403_v52 = vsub.f32 %v396_v50, %v402_v51 }
 0x191   :  { %v404_v53 = vmul.f32 1.442695, %v403_v52 }
 0x193   :  { %549 = vpow2.f32 %v404_v53 }
 0x1a0   :  { %v550_v54 = vpop.eup %549 }
 0x1a1   :  { %406 = vadd.xlane.f32.xlu0 %v550_v54 }
 0x22a   :  { %v407_v55 = vpop.xlane.xlu0 %406 }
 0x22b   :  { %551 = vrcp.f32 %v407_v55 }
 0x238   :  { %v552_v56 = vpop.eup %551 }
 0x239   :  { %v409_v57 = vmul.f32 %v552_v56, %v550_v54 }
 0x23b   :  { %410 = vst [vmem:[#allocation7] sm:$0xff] %v409_v57 }
 0x23c   :  { %604 = shalt.err (!%p601_p0)
}
 0x23d   :  { %420 = dma.vmem_to_hbm [thread:$0]  %s418_s24, 128, %s659_s3, [#allocation4]  }
 0x23e   :  { %617 = dma.done.wait [#allocation4], 128  }
 0x23f   :  { %618 = vsyncadd [#allocation4], 4294967168 }
 0x240   :  { %424 = vsyncpa [#allocation3], 1 }
 0x241   :  { %425 = vsyncpa [#allocation6], 1 }
 0x242   :  { %426 = vsyncpa [#allocation4], 1 }

</bundles_post_ra>
